<compile_context>
chip_gen: v5e
topology: v5e:2x2
jax: 0.10.0
libtpu: 0.0.40
codegen_flags: <defaults>
</compile_context>

<pallas_src>
import math

import jax
import jax.numpy as jnp
from jax.experimental import pallas as pl
from jax.experimental.pallas import tpu as pltpu

_LANE = 512            # lane-dense last dim: multiple of 128 -> unmasked full vst
_MAX_BLOCK_ROWS = 1024 # (1024, 512) f32 block = 2 MiB/plane


def _isac_tight_kernel(real_ref, imag_ref, out_ref):
    """Forward pass: emit both planes into one stacked (2, rows, lane) slab."""
    out_ref[0] = real_ref[...]
    out_ref[1] = imag_ref[...]


def _slab_geometry(total):
    """Return (rows_padded, block_rows) for a (rows, _LANE) f32 slab."""
    rows = pl.cdiv(total, _LANE)
    if rows <= _MAX_BLOCK_ROWS:
        # Single block covering the full slab: (8,128) constraint is satisfied
        # because block_shape == full array dims.
        return rows, rows
    # Multi-block: pick the largest block row count (multiple of 8) that
    # divides rows exactly so no row padding is needed.
    for cand in (1024, 512, 256, 128, 64, 32, 16, 8):
        if rows % cand == 0:
            return rows, cand
    # Fallback: pad rows up to a multiple of the max block.
    rows_padded = ((rows + _MAX_BLOCK_ROWS - 1) // _MAX_BLOCK_ROWS) * _MAX_BLOCK_ROWS
    return rows_padded, _MAX_BLOCK_ROWS


def isac_tight_forward(kernels_real, kernels_imag):
    """JAX/Pallas equivalent of ISACTight.forward().

    Args:
      kernels_real: float32 array, shape (n_filters, 1, kernel_size)
      kernels_imag: float32 array, same shape

    Returns:
      complex64 array of shape (n_filters, 1, kernel_size)
    """
    assert kernels_real.shape == kernels_imag.shape
    orig_shape = kernels_real.shape
    if kernels_real.dtype != jnp.float32:
        kernels_real = kernels_real.astype(jnp.float32)
    if kernels_imag.dtype != jnp.float32:
        kernels_imag = kernels_imag.astype(jnp.float32)

    total = math.prod(orig_shape)
    rows_padded, block_rows = _slab_geometry(total)
    padded_total = rows_padded * _LANE
    needs_pad = padded_total != total

    def to_slab(x):
        flat = x.reshape(-1)
        if needs_pad:
            flat = jnp.pad(flat, (0, padded_total - total))
        return flat.reshape(rows_padded, _LANE)

    r2 = to_slab(kernels_real)
    i2 = to_slab(kernels_imag)

    grid_r = rows_padded // block_rows
    in_spec = pl.BlockSpec((block_rows, _LANE), lambda i: (i, 0))
    out_spec = pl.BlockSpec((2, block_rows, _LANE), lambda i: (0, i, 0))

    out = pl.pallas_call(
        _isac_tight_kernel,
        grid=(grid_r,),
        in_specs=[in_spec, in_spec],
        out_specs=out_spec,
        out_shape=jax.ShapeDtypeStruct((2, rows_padded, _LANE), jnp.float32),
        compiler_params=pltpu.CompilerParams(
            dimension_semantics=("parallel",),
            vmem_limit_bytes=32 * 1024 * 1024,
        ),
    )(r2, i2)

    out_r = out[0]
    out_i = out[1]
    if needs_pad:
        out_r = out_r.reshape(-1)[:total]
        out_i = out_i.reshape(-1)[:total]
    out_r = out_r.reshape(orig_shape)
    out_i = out_i.reshape(orig_shape)
    # Single fused elementwise complex pack reading each plane exactly once.
    return jax.lax.complex(out_r, out_i)


if __name__ == "__main__":
    # Deterministic synthetic "ISAC kernels": (n_filters, 1, kernel_size)
    n_filters = 8
    kernel_size = 128
    d = 4            # stride (unused in forward)
    Ls = 1024        # signal length (unused in forward)

    key = jax.random.PRNGKey(0)
    k_real_key, k_imag_key = jax.random.split(key)
    kernels_real = jax.random.normal(
        k_real_key, (n_filters, 1, kernel_size), dtype=jnp.float32)
    kernels_imag = jax.random.normal(
        k_imag_key, (n_filters, 1, kernel_size), dtype=jnp.float32)

    fwd = jax.jit(isac_tight_forward)
    out = fwd(kernels_real, kernels_imag)
    out = jax.block_until_ready(out)

    # Reference check (plain JAX).
    ref = kernels_real.astype(jnp.complex64) + 1j * kernels_imag.astype(jnp.complex64)
    assert out.shape == (n_filters, 1, kernel_size)
    assert out.dtype == jnp.complex64
    assert jnp.allclose(out, ref), "mismatch vs reference"

    print("KERNEL_OK")
</pallas_src>

<mosaic_0001>
module attributes {stable_mosaic.version = 11 : i64} {
  func.func @_isac_tight_kernel(%arg0: i32, %arg1: memref<2x512xf32, #tpu.memory_space<vmem>>, %arg2: memref<2x512xf32, #tpu.memory_space<vmem>>, %arg3: memref<2x2x512xf32, #tpu.memory_space<vmem>>) attributes {dimension_semantics = [#tpu.dimension_semantics<parallel>], iteration_bounds = array<i64: 1>, scalar_prefetch = 0 : i64, scratch_operands = 0 : i64, tpu.core_type = #tpu.core_type<tc>, window_params = [{transform_indices = @transform_0, window_bounds = array<i64: 2, 512>}, {transform_indices = @transform_1, window_bounds = array<i64: 2, 512>}, {transform_indices = @transform_2, window_bounds = array<i64: 2, 2, 512>}]} {
    %c0 = arith.constant 0 : index
    %c0_0 = arith.constant 0 : index
    %0 = vector.load %arg1[%c0, %c0_0] : memref<2x512xf32, #tpu.memory_space<vmem>>, vector<2x512xf32>
    %c0_1 = arith.constant 0 : index
    %c0_2 = arith.constant 0 : index
    %c0_3 = arith.constant 0 : index
    %1 = vector.load %arg3[%c0_1, %c0_2, %c0_3] : memref<2x2x512xf32, #tpu.memory_space<vmem>>, vector<1x2x512xf32>
    %2 = vector.shape_cast %1 : vector<1x2x512xf32> to vector<2x512xf32>
    %3 = vector.shape_cast %0 : vector<2x512xf32> to vector<1x2x512xf32>
    tpu.vector_store %arg3[%c0_1, %c0_2, %c0_3], %3 {strides = array<i32>} : memref<2x2x512xf32, #tpu.memory_space<vmem>>, vector<1x2x512xf32>,
    %c0_4 = arith.constant 0 : index
    %c0_5 = arith.constant 0 : index
    %4 = vector.load %arg2[%c0_4, %c0_5] : memref<2x512xf32, #tpu.memory_space<vmem>>, vector<2x512xf32>
    %c1 = arith.constant 1 : index
    %c0_6 = arith.constant 0 : index
    %c0_7 = arith.constant 0 : index
    %5 = vector.load %arg3[%c1, %c0_6, %c0_7] : memref<2x2x512xf32, #tpu.memory_space<vmem>>, vector<1x2x512xf32>
    %6 = vector.shape_cast %5 : vector<1x2x512xf32> to vector<2x512xf32>
    %7 = vector.shape_cast %4 : vector<2x512xf32> to vector<1x2x512xf32>
    tpu.vector_store %arg3[%c1, %c0_6, %c0_7], %7 {strides = array<i32>} : memref<2x2x512xf32, #tpu.memory_space<vmem>>, vector<1x2x512xf32>,
    return
  }
  func.func @transform_0(%arg0: i32) -> (i32, i32) {
    %c0_i32 = arith.constant 0 : i32
    %c0_i32_0 = arith.constant 0 : i32
    return %arg0, %c0_i32 : i32, i32
  }
  func.func @transform_1(%arg0: i32) -> (i32, i32) {
    %c0_i32 = arith.constant 0 : i32
    %c0_i32_0 = arith.constant 0 : i32
    return %arg0, %c0_i32 : i32, i32
  }
  func.func @transform_2(%arg0: i32) -> (i32, i32, i32) {
    %c0_i32 = arith.constant 0 : i32
    %c0_i32_0 = arith.constant 0 : i32
    %c0_i32_1 = arith.constant 0 : i32
    return %c0_i32, %arg0, %c0_i32_0 : i32, i32, i32
  }
}

</mosaic_0001>

<bundles_post_ra>
// kernel: squeeze.3
= control target key start
LH: loop header
LB: loop body
LE: loop exit
PB: predicated region body
PF: predicated region fallthrough
CT: control target
= control target key end

     0   :  { %s72_s0 = inlined_call_operand.vmem [shape: f32[1,2,512], index: 0, kind: input, shape index: {}]   ;;  %s73_s1 = inlined_call_operand.vmem [shape: f32[8,1,128], index: 1, kind: output, shape index: {}]  }
   0x1   :  { %v32_v0 = vld [vmem:[%s72_s0 + $0x6] sm:$0x3]  ;;  %v33_v1 = vld [vmem:[%s72_s0 + $0x4] sm:$0x3]  ;;  %v34_v2 = vld [vmem:[%s72_s0 + $0x2] sm:$0x3] }
   0x2   :  { %7 = vst [vmem:[#allocation0 + $0x8] sm:$0x3] %v32_v0  ;;  %v16_v3 = vld [vmem:[%s72_s0] sm:$0x3] }
   0x3   :  { %11 = vst [vmem:[#allocation0 + $0x18] sm:$0x3] %v33_v1 }
   0x4   :  { %15 = vst [vmem:[#allocation0] sm:$0x3] %v34_v2 }
   0x5   :  { %17 = vst [vmem:[#allocation0 + $0x10] sm:$0x3] %v16_v3 }
   0x9   :  { %v29_v4 = vld [vmem:[#allocation0 + $0x8] sm:$0x3]  }
   0xa   :  { %v25_v5 = vld [vmem:[#allocation0 + $0x18] sm:$0x3]   ;;  %37 = vst [vmem:[%s73_s1 + $0x3] ss:$4 sm:$0x3] %v29_v4  }
   0xb   :  { %v21_v6 = vld [vmem:[#allocation0] sm:$0x3]   ;;  %36 = vst [vmem:[%s73_s1 + $0x2] ss:$4 sm:$0x3] %v25_v5  }
   0xc   :  { %v18_v7 = vld [vmem:[#allocation0 + $0x10] sm:$0x3]   ;;  %35 = vst [vmem:[%s73_s1 + $0x1] ss:$4 sm:$0x3] %v21_v6  }
   0xd   :  { %19 = vst [vmem:[%s73_s1] ss:$4 sm:$0x3] %v18_v7  }

// kernel: custom-call
= control target key start
LH: loop header
LB: loop body
LE: loop exit
PB: predicated region body
PF: predicated region fallthrough
CT: control target
= control target key end

     0   :  { %s105_s0 = inlined_call_operand.vmem [shape: f32[8,1,128], index: 0, kind: input, shape index: {}]   ;;  %s106_s1 = inlined_call_operand.vmem [shape: f32[8,1,128], index: 1, kind: input, shape index: {}]   ;;  %s107_s2 = inlined_call_operand.hbm [shape: c64[8,1,128], index: 2, kind: output, shape index: {}]  }
   0x1   :  { %s3_s11 = scalar_lea.hbm %s107_s2, 8 }
   0x2   :  { %4 = vsyncpa [#allocation0], 0  ;;  %s6_s14 = sshll.u32 %s105_s0, 4  ;;  %s8_s17 = sshll.u32 %s107_s2, 4  ;;  %s7_s14 = int_to_ptr.vmem [resolvable:$true] %s6_s14  ;;  %s9_s17 = int_to_ptr.hbm [resolvable:$true] %s8_s17 }
   0x3   :  { %11 = dma.vmem_to_hbm [thread:$0]  %s7_s14, 128, %s9_s17, [#allocation0] }
   0x4   :  { %74 = dma.done.wait [#allocation0], 128  }
   0x5   :  { %75 = vsyncadd [#allocation0], 4294967168 }
   0x6   :  { %14 = vsyncpa [#allocation0], 1 }
   0x7   :  { %15 = vsyncpa [#allocation1], 0  ;;  %s17_s20 = sshll.u32 %s106_s1, 4  ;;  %s19_s21 = sshll.u32 %s3_s11, 4  ;;  %s18_s20 = int_to_ptr.vmem [resolvable:$true] %s17_s20  ;;  %s20_s21 = int_to_ptr.hbm [resolvable:$true] %s19_s21 }
   0x8   :  { %22 = dma.vmem_to_hbm [thread:$0]  %s18_s20, 128, %s20_s21, [#allocation1] }
   0x9   :  { %76 = dma.done.wait [#allocation1], 128  }
   0xa   :  { %77 = vsyncadd [#allocation1], 4294967168 }
   0xb   :  { %25 = vsyncpa [#allocation1], 1 }

// kernel: isac_tight_forward.1
= control target key start
LH: loop header
LB: loop body
LE: loop exit
PB: predicated region body
PF: predicated region fallthrough
CT: control target
= control target key end

     0   :  { %s48_s0 = inlined_call_operand.vmem [shape: f32[2,512], index: 0, kind: input, shape index: {}]   ;;  %s49_s2 = inlined_call_operand.vmem [shape: f32[2,2,512], index: 2, kind: output, shape index: {}]   ;;  %s50_s1 = inlined_call_operand.vmem [shape: f32[2,512], index: 1, kind: input, shape index: {}]  }
   0x1   :  { %v11_v0 = vld [vmem:[%s48_s0] sm:$0xff] }
   0x2   :  { %v13_v1 = vld [vmem:[%s50_s1] sm:$0xff]  ;;  %12 = vst [vmem:[%s49_s2] sm:$0xff] %v11_v0 }
   0x3   :  { %20 = vst [vmem:[%s49_s2 + $0x8] sm:$0xff] %v13_v1 }

</bundles_post_ra>
